<compile_context>
chip_gen: v6e
topology: v6e:2x2x1
jax: 0.10.0
libtpu: 0.0.40
codegen_flags: <defaults>
</compile_context>

<pallas_src>
import functools

import jax
import jax.numpy as jnp
from jax.experimental import pallas as pl
from jax.experimental.pallas import tpu as pltpu

_LANES = 128


def _class_loss_kernel(x_ref, y_ref, out_ref, *, inv_b, sub, fold,
                       valid_rows, inner_tiles, two_axis):
    """Accumulate sum((y - sigmoid(x))^2) into a resident (1, fold, L) block."""
    if two_axis:
        s = pl.program_id(0)
        i = pl.program_id(1)
        step = s * inner_tiles + i          # logical tile index along the row axis
        last = pl.num_programs(1) - 1
    else:
        i = pl.program_id(0)
        step = i
        last = pl.num_programs(0) - 1

    @pl.when(i == 0)
    def _():
        out_ref[...] = jnp.zeros_like(out_ref)

    block_rows, lanes = x_ref.shape
    n_sub = block_rows // sub
    row_base = step * block_rows

    def body(c, acc):
        r0 = pl.multiple_of(c * sub, sub)
        x = x_ref[pl.ds(r0, sub), :].astype(jnp.float32)
        y = y_ref[pl.ds(r0, sub), :].astype(jnp.float32)
        pred = jax.nn.sigmoid(x)      # EUP; large slack vs the HBM feed on all gens
        d = y - pred                  # VPU
        sq = d * d                    # VPU
        if valid_rows is not None:
            # Mask rows past the end of the real data (partial / out-of-range tile);
            # this replaces the old wrapper-side padding copy.
            ridx = row_base + r0 + jax.lax.broadcasted_iota(
                jnp.int32, (sub, lanes), 0)
            sq = jnp.where(ridx < valid_rows, sq, 0.0)
        # Fold groups of `fold` sublanes with plain vector adds (no cross-lane XLU).
        return acc + jnp.sum(sq.reshape(sub // fold, fold, lanes), axis=0)

    acc = jax.lax.fori_loop(0, n_sub, body,
                            jnp.zeros((fold, lanes), jnp.float32), unroll=True)
    out_ref[...] += acc[None]

    @pl.when(i == last)
    def _():
        # Fold the final mean over the batch (divide by B) into the epilogue.
        # Valid because the reduction axis is the last (fastest) grid axis.
        out_ref[...] = out_ref[...] * inv_b


def _pick_sub(block_rows, target=512):
    """Largest divisor of block_rows <= target (preferring multiples of 8)."""
    if block_rows <= target:
        return block_rows
    for s in range(target, 7, -1):
        if block_rows % s == 0 and s % 8 == 0:
            return s
    for s in range(target, 0, -1):
        if block_rows % s == 0:
            return s
    return block_rows


def class_loss(logits, label, key_weight=None, *, block_rows=None, n_split=1):
    """Pallas equivalent of ClassLoss.forward."""
    del key_weight  # unused by the reference module's forward
    B, C = logits.shape
    assert label.shape == (B, C)
    total = B * C

    # Zero-copy 2D view: lane-dense (rows, 128) when possible, else native (B, C).
    if total % _LANES == 0:
        R, L = total // _LANES, _LANES
        x = logits.reshape(R, L)
        y = label.reshape(R, L)
    else:
        R, L = B, C
        x, y = logits, label

    bytes_per_row = L * (jnp.dtype(logits.dtype).itemsize +
                         jnp.dtype(label.dtype).itemsize)

    if block_rows is None:
        # ~8 MiB of streamed input (both operands combined) per grid step.
        block_rows = max(8, ((8 << 20) // bytes_per_row) // 8 * 8)
    block_rows = min(block_rows, R)
    if block_rows != R and block_rows % 8 != 0:
        block_rows = max(8, (block_rows // 8) * 8)

    sub = _pick_sub(block_rows)
    fold = 8 if sub % 8 == 0 else sub

    n_split = max(1, min(n_split, pl.cdiv(R, block_rows)))
    inner_tiles = pl.cdiv(pl.cdiv(R, n_split), block_rows)
    covered = n_split * inner_tiles * block_rows
    needs_mask = covered != R
    n_valid_blocks = pl.cdiv(R, block_rows)

    kernel = functools.partial(
        _class_loss_kernel,
        inv_b=1.0 / B, sub=sub, fold=fold,
        valid_rows=R if needs_mask else None,
        inner_tiles=inner_tiles, two_axis=n_split > 1)

    if n_split > 1:
        grid = (n_split, inner_tiles)

        def in_map(s, i):
            # Clamp so any tile fully past the end of the data re-reads the last
            # valid block; its contribution is masked to zero inside the kernel.
            return (jnp.minimum(s * inner_tiles + i, n_valid_blocks - 1), 0)

        out_map = lambda s, i: (s, 0, 0)
        semantics = ("parallel", "arbitrary")
    else:
        grid = (inner_tiles,)
        in_map = lambda i: (i, 0)
        out_map = lambda i: (0, 0, 0)
        semantics = ("arbitrary",)

    vmem_limit = int(2 * block_rows * bytes_per_row       # double-buffered inputs
                     + 2 * n_split * fold * L * 4          # (tiny) output blocks
                     + 8 * sub * L * 4                     # sub-chunk temporaries
                     + (2 << 20))                          # compiler scratch slack
    vmem_limit = max(16 << 20, min(vmem_limit, 64 << 20))

    partials = pl.pallas_call(
        kernel,
        out_shape=jax.ShapeDtypeStruct((n_split, fold, L), jnp.float32),
        grid=grid,
        in_specs=[
            pl.BlockSpec((block_rows, L), in_map),
            pl.BlockSpec((block_rows, L), in_map),
        ],
        out_specs=pl.BlockSpec((1, fold, L), out_map),
        compiler_params=pltpu.CompilerParams(
            dimension_semantics=semantics,
            vmem_limit_bytes=vmem_limit),
    )(x, y)

    # Each (fold, L) partial is already scaled by 1/B; summing them gives the mean.
    return jnp.sum(partials)


def _ref_loss(logits, label):
    p = jax.nn.sigmoid(logits.astype(jnp.float32))
    return jnp.sum((label.astype(jnp.float32) - p) ** 2, axis=1).mean()


if __name__ == "__main__":
    key = jax.random.PRNGKey(0)
    k1, k2, k3, k4 = jax.random.split(key, 4)

    # Primary small case (lane-dense path, single tile).
    B, C = 8, 32
    logits = jax.random.normal(k1, (B, C), dtype=jnp.float32)
    label = (jax.random.uniform(k2, (B, C)) > 0.5).astype(jnp.float32)
    loss = class_loss(logits, label)
    jax.block_until_ready(loss)
    assert jnp.allclose(loss, _ref_loss(logits, label), rtol=1e-4, atol=1e-5)

    # Lane-dense path with multiple tiles + in-kernel tail masking.
    B2, C2 = 10, 256
    lg2 = jax.random.normal(k3, (B2, C2), dtype=jnp.float32)
    lb2 = (jax.random.uniform(k4, (B2, C2)) > 0.5).astype(jnp.float32)
    loss2 = class_loss(lg2, lb2, block_rows=8)
    jax.block_until_ready(loss2)
    assert jnp.allclose(loss2, _ref_loss(lg2, lb2), rtol=1e-4, atol=1e-5)

    # Ragged (B*C % 128 != 0) fallback path: native (B, C) layout + row masking.
    B3, C3 = 20, 30
    lg3 = jax.random.normal(k1, (B3, C3), dtype=jnp.float32)
    lb3 = (jax.random.uniform(k2, (B3, C3)) > 0.5).astype(jnp.float32)
    loss3 = class_loss(lg3, lb3, block_rows=8)
    jax.block_until_ready(loss3)
    assert jnp.allclose(loss3, _ref_loss(lg3, lb3), rtol=1e-4, atol=1e-5)

    # bf16 ingestion (no wrapper-side pre-cast; kernel accumulates in f32).
    loss_bf16 = class_loss(logits.astype(jnp.bfloat16), label.astype(jnp.bfloat16))
    jax.block_until_ready(loss_bf16)
    assert jnp.allclose(loss_bf16,
                        _ref_loss(logits.astype(jnp.bfloat16),
                                  label.astype(jnp.bfloat16)),
                        rtol=1e-4, atol=1e-4)

    print("KERNEL_OK")
</pallas_src>

<mosaic_0001>
module attributes {stable_mosaic.version = 11 : i64} {
  func.func @_class_loss_kernel(%arg0: i32, %arg1: memref<2x128xf32, #tpu.memory_space<vmem>>, %arg2: memref<2x128xf32, #tpu.memory_space<vmem>>, %arg3: memref<1x2x128xf32, #tpu.memory_space<vmem>>) attributes {dimension_semantics = [#tpu.dimension_semantics<arbitrary>], iteration_bounds = array<i64: 1>, scalar_prefetch = 0 : i64, scratch_operands = 0 : i64, tpu.core_type = #tpu.core_type<tc>, window_params = [{transform_indices = @transform_0, window_bounds = array<i64: 2, 128>}, {transform_indices = @transform_1, window_bounds = array<i64: 2, 128>}, {pipeline_mode = #tpu.pipeline_mode<synchronous>, transform_indices = @transform_2, window_bounds = array<i64: 1, 2, 128>}]} {
    %c0_i32 = arith.constant 0 : i32
    %0 = arith.cmpi eq, %arg0, %c0_i32 : i32
    %1 = arith.extui %0 : i1 to i32
    %c0_i32_0 = arith.constant 0 : i32
    %2 = arith.cmpi ne, %1, %c0_i32_0 : i32
    scf.if %2 {
      %cst_13 = arith.constant 0.000000e+00 : f32
      %27 = vector.broadcast %cst_13 : f32 to vector<1x2x128xf32>
      %c0_14 = arith.constant 0 : index
      %c0_15 = arith.constant 0 : index
      %c0_16 = arith.constant 0 : index
      %28 = vector.load %arg3[%c0_14, %c0_15, %c0_16] : memref<1x2x128xf32, #tpu.memory_space<vmem>>, vector<1x2x128xf32>
      tpu.vector_store %arg3[%c0_14, %c0_15, %c0_16], %27 {strides = array<i32>} : memref<1x2x128xf32, #tpu.memory_space<vmem>>, vector<1x2x128xf32>,
    } else {
    }
    %cst = arith.constant 0.000000e+00 : f32
    %3 = vector.broadcast %cst : f32 to vector<2x128xf32>
    %c0_i32_1 = arith.constant 0 : i32
    %c2_i32 = arith.constant 2 : i32
    %4 = arith.muli %c0_i32_1, %c2_i32 : i32
    %5 = tpu.assume_multiple %4, 2 : i32
    %6 = arith.index_cast %5 : i32 to index
    %c0 = arith.constant 0 : index
    %7 = vector.load %arg1[%6, %c0] : memref<2x128xf32, #tpu.memory_space<vmem>>, vector<2x128xf32>
    %8 = arith.index_cast %5 : i32 to index
    %c0_2 = arith.constant 0 : index
    %9 = vector.load %arg2[%8, %c0_2] : memref<2x128xf32, #tpu.memory_space<vmem>>, vector<2x128xf32>
    %10 = arith.negf %7 : vector<2x128xf32>
    %11 = math.exp %10 : vector<2x128xf32>
    %cst_3 = arith.constant 1.000000e+00 : f32
    %12 = vector.broadcast %cst_3 : f32 to vector<2x128xf32>
    %13 = arith.addf %12, %11 : vector<2x128xf32>
    %14 = arith.divf %12, %13 : vector<2x128xf32>
    %15 = arith.subf %9, %14 : vector<2x128xf32>
    %16 = arith.mulf %15, %15 : vector<2x128xf32>
    %17 = vector.shape_cast %16 : vector<2x128xf32> to vector<1x2x128xf32>
    %cst_4 = arith.constant dense<0.000000e+00> : vector<2x128xf32>
    %18 = vector.multi_reduction <add>, %17, %cst_4 [0] : vector<1x2x128xf32> to vector<2x128xf32>
    %19 = arith.addf %3, %18 : vector<2x128xf32>
    %c1_i32 = arith.constant 1 : i32
    %c0_5 = arith.constant 0 : index
    %c0_6 = arith.constant 0 : index
    %c0_7 = arith.constant 0 : index
    %20 = vector.load %arg3[%c0_5, %c0_6, %c0_7] : memref<1x2x128xf32, #tpu.memory_space<vmem>>, vector<1x2x128xf32>
    %21 = vector.shape_cast %19 : vector<2x128xf32> to vector<1x2x128xf32>
    %22 = arith.addf %20, %21 : vector<1x2x128xf32>
    %c0_8 = arith.constant 0 : index
    %c0_9 = arith.constant 0 : index
    %c0_10 = arith.constant 0 : index
    %23 = vector.load %arg3[%c0_8, %c0_9, %c0_10] : memref<1x2x128xf32, #tpu.memory_space<vmem>>, vector<1x2x128xf32>
    tpu.vector_store %arg3[%c0_8, %c0_9, %c0_10], %22 {strides = array<i32>} : memref<1x2x128xf32, #tpu.memory_space<vmem>>, vector<1x2x128xf32>,
    %c0_i32_11 = arith.constant 0 : i32
    %24 = arith.cmpi eq, %arg0, %c0_i32_11 : i32
    %25 = arith.extui %24 : i1 to i32
    %c0_i32_12 = arith.constant 0 : i32
    %26 = arith.cmpi ne, %25, %c0_i32_12 : i32
    scf.if %26 {
      %c0_13 = arith.constant 0 : index
      %c0_14 = arith.constant 0 : index
      %c0_15 = arith.constant 0 : index
      %27 = vector.load %arg3[%c0_13, %c0_14, %c0_15] : memref<1x2x128xf32, #tpu.memory_space<vmem>>, vector<1x2x128xf32>
      %cst_16 = arith.constant 1.250000e-01 : f32
      %28 = vector.broadcast %cst_16 : f32 to vector<1x2x128xf32>
      %29 = arith.mulf %27, %28 : vector<1x2x128xf32>
      %c0_17 = arith.constant 0 : index
      %c0_18 = arith.constant 0 : index
      %c0_19 = arith.constant 0 : index
      %30 = vector.load %arg3[%c0_17, %c0_18, %c0_19] : memref<1x2x128xf32, #tpu.memory_space<vmem>>, vector<1x2x128xf32>
      tpu.vector_store %arg3[%c0_17, %c0_18, %c0_19], %29 {strides = array<i32>} : memref<1x2x128xf32, #tpu.memory_space<vmem>>, vector<1x2x128xf32>,
    } else {
    }
    return
  }
  func.func @transform_0(%arg0: i32) -> (i32, i32) {
    %c0_i32 = arith.constant 0 : i32
    %c0_i32_0 = arith.constant 0 : i32
    return %arg0, %c0_i32 : i32, i32
  }
  func.func @transform_1(%arg0: i32) -> (i32, i32) {
    %c0_i32 = arith.constant 0 : i32
    %c0_i32_0 = arith.constant 0 : i32
    return %arg0, %c0_i32 : i32, i32
  }
  func.func @transform_2(%arg0: i32) -> (i32, i32, i32) {
    %c0_i32 = arith.constant 0 : i32
    %c0_i32_0 = arith.constant 0 : i32
    %c0_i32_1 = arith.constant 0 : i32
    %c0_i32_2 = arith.constant 0 : i32
    return %c0_i32, %c0_i32_0, %c0_i32_1 : i32, i32, i32
  }
}

</mosaic_0001>

<bundles_post_ra>
// kernel: tpu_custom_call.1
= control target key start
LH: loop header
LB: loop body
LE: loop exit
PB: predicated region body
PF: predicated region fallthrough
CT: control target
= control target key end

     0   :  { %7 = vsyncpa [#allocation3], 0  ;;  %s181_s0 = inlined_call_operand.hbm [shape: f32[2,128], index: 0, kind: input, shape index: {}]   ;;  %s182_s1 = inlined_call_operand.hbm [shape: f32[2,128], index: 1, kind: input, shape index: {}]   ;;  %s183_s2 = inlined_call_operand.hbm [shape: f32[1,2,128], index: 2, kind: output, shape index: {}]  }
   0x1   :  { %8 = vsyncpa [#allocation6], 0 }
   0x2   :  { %9 = vsyncpa [#allocation4], 0  ;;  %s153_s9 = smov [#allocation2]   ;;  %s154_s11 = smov [#allocation5]  }
   0x3   :  { %s16_s10 = sshll.u32 %s153_s9, 4  ;;  %s26_s12 = sshll.u32 %s154_s11, 4  ;;  %s17_s10 = int_to_ptr.vmem [resolvable:$true] %s16_s10  ;;  %s27_s12 = int_to_ptr.vmem [resolvable:$true] %s26_s12 }
   0x4   :  { %s95_s13 = scalar_lea.vmem %s17_s10, 32  ;;  %p100_p1 = scmp.lt.s32.totalorder %s17_s10, %s17_s10 }
   0x5   :  { %p96_p0 = scmp.ne.s32.totalorder %s17_s10, %s95_s13  ;;  %p101_p2 = scmp.lt.s32.totalorder %s95_s13, %s95_s13 }
   0x7   :  { %p102_p3 = por %p101_p2, %p100_p1 }
   0x9   :  { %p103_p4 = pnand %p102_p3, %p96_p0 }
   0xb   :  { %106 = shalt.err (!%p103_p4)
}
   0xc   :  { %19 = dma.hbm_to_vmem [thread:$0]  %s181_s0, 32, %s17_s10, [#allocation3]  }
   0xd   :  { %s115_s16 = scalar_lea.vmem %s27_s12, 32  ;;  %p120_p6 = scmp.lt.s32.totalorder %s27_s12, %s27_s12 }
   0xe   :  { %p116_p5 = scmp.ne.s32.totalorder %s27_s12, %s115_s16  ;;  %p121_p7 = scmp.lt.s32.totalorder %s115_s16, %s115_s16 }
  0x10   :  { %p122_p8 = por %p121_p7, %p120_p6 }
  0x12   :  { %p123_p9 = pnand %p122_p8, %p116_p5 }
  0x14   :  { %126 = shalt.err (!%p123_p9)
}
  0x15   :  { %29 = dma.hbm_to_vmem [thread:$0]  %s182_s1, 32, %s27_s12, [#allocation6]  }
  0x16   :  { %147 = dma.done.wait [#allocation3], 32  }
  0x17   :  { %148 = vsyncadd [#allocation3], 4294967264 }
  0x18   :  { %149 = dma.done.wait [#allocation6], 32  }
  0x19   :  { %150 = vsyncadd [#allocation6], 4294967264  ;;  %v155_v0 = vmov 0.0   ;;  %v41_v1 = vld [vmem:[#allocation2] sm:$0x3]  ;;  %s156_s0 = smov [#allocation7]  }
  0x1a   :  { %40 = vst [vmem:[#allocation7] sm:$0x3] %v155_v0  ;;  %v78_v2 = vmul.f32 -1.442695, %v41_v1  ;;  %v42_v5 = vld [vmem:[#allocation5] sm:$0x3] }
  0x1b   :  { %s68_s1 = sshll.u32 %s156_s0, 4  ;;  %s69_s1 = int_to_ptr.vmem [resolvable:$true] %s68_s1 }
  0x1c   :  { %83 = vpow2.f32 %v78_v2  ;;  %s127_s19 = scalar_lea.vmem %s69_s1, 32  ;;  %p132_p11 = scmp.lt.s32.totalorder %s69_s1, %s69_s1 }
  0x1d   :  { %p128_p10 = scmp.ne.s32.totalorder %s69_s1, %s127_s19  ;;  %p133_p12 = scmp.lt.s32.totalorder %s127_s19, %s127_s19 }
  0x1f   :  { %p134_p13 = por %p133_p12, %p132_p11 }
  0x21   :  { %v53_v8 = vld [vmem:[#allocation7] sm:$0x3]  ;;  %p135_p0 = pnand %p134_p13, %p128_p10 }
  0x29   :  { %v84_v3 = vpop.eup %83 }
  0x2a   :  { %v46_v4 = vadd.f32 1.0, %v84_v3 }
  0x2c   :  { %85 = vrcp.f32 %v46_v4 }
  0x39   :  { %v86_v6 = vpop.eup %85 }
  0x3a   :  { %v49_v7 = vsub.f32 %v42_v5, %v86_v6 }
  0x3c   :  { %v50_v9 = vmul.f32 %v49_v7, %v49_v7 }
  0x3e   :  { %v54_v10 = vadd.f32 %v53_v8, %v50_v9 }
  0x40   :  { %55 = vst [vmem:[#allocation7] sm:$0x3] %v54_v10 }
  0x47   :  { %v59_v11 = vld [vmem:[#allocation7] sm:$0x3] }
  0x48   :  { %v60_v12 = vmul.f32 0.125, %v59_v11 }
  0x4a   :  { %61 = vst [vmem:[#allocation7] sm:$0x3] %v60_v12 }
  0x4b   :  { %138 = shalt.err (!%p135_p0)
}
  0x4c   :  { %71 = dma.vmem_to_hbm [thread:$0]  %s69_s1, 32, %s183_s2, [#allocation4]  }
  0x4d   :  { %151 = dma.done.wait [#allocation4], 32  }
  0x4e   :  { %152 = vsyncadd [#allocation4], 4294967264 }
  0x4f   :  { %75 = vsyncpa [#allocation3], 1 }
  0x50   :  { %76 = vsyncpa [#allocation6], 1 }
  0x51   :  { %77 = vsyncpa [#allocation4], 1 }

</bundles_post_ra>
